<compile_context>
chip_gen: v7x
topology: tpu7x:2x2x1
jax: 0.10.0
libtpu: 0.0.40
codegen_flags: <defaults>
</compile_context>

<pallas_src>
import jax
import jax.numpy as jnp
from jax import lax
from jax.experimental import pallas as pl
from jax.experimental.pallas import tpu as pltpu

_MiB = 1024 * 1024


def _vmem_budget_bytes():
    """Per-generation scoped-VMEM budget (leave headroom for XLA scratch)."""
    try:
        info = pltpu.get_tpu_info()
        cap = int(getattr(info, "vmem_capacity_bytes", 64 * _MiB))
    except Exception:
        cap = 64 * _MiB  # most conservative physical VMEM (v7x)
    # v7x (64 MiB physical) -> 48 MiB scoped; v5e/v6e (128 MiB) -> 64 MiB.
    return int(min(max(32 * _MiB, cap * 3 // 4), 64 * _MiB))


def _fused_kernel(x_ref, w1_ref, b1_ref, w2_ref, b2_ref, o_ref, *, inv_hw):
    # x_ref block: (nb, C, HW); weights/biases are full (small) arrays.
    x_blk = x_ref[...]                                               # (nb, C, HW)

    # Squeeze: global average over the flattened spatial (lane) axis with an
    # f32 accumulator (no explicit full-tile f32 upcast of x).
    s = jnp.sum(x_blk, axis=2, dtype=jnp.float32) * jnp.float32(inv_hw)  # (nb, C)

    # Excitation: 1x1 convs are channel-mixing matmuls over the batch block.
    h = jnp.dot(s, w1_ref[...], preferred_element_type=jnp.float32) + b1_ref[...]
    h = jnp.maximum(h, 0.0)                                          # (nb, C_red)
    z = jnp.dot(h, w2_ref[...], preferred_element_type=jnp.float32) + b2_ref[...]
    g = jax.nn.sigmoid(z)                                            # (nb, C) f32

    # Scale: broadcast the channel gate over spatial; multiply in x's dtype
    # (gate rounded to x.dtype -- <=1 bf16 ulp difference vs an f32 gate).
    o_ref[...] = (x_blk * g.astype(x_blk.dtype)[:, :, None]).astype(o_ref.dtype)


def se_module(x, w1, b1, w2, b2, *, force_hw_tiled=False,
              target_tile_bytes=None, vmem_limit_bytes=None):
    """x: (N, C, H, W). w1: (C_red, C), b1: (C_red,), w2: (C, C_red), b2: (C,)."""
    N, C, H, W = x.shape
    HW = H * W
    C_red = w1.shape[0]
    itemsize = jnp.dtype(x.dtype).itemsize

    if vmem_limit_bytes is None:
        vmem_limit_bytes = _vmem_budget_bytes()
    if target_tile_bytes is None:
        # ~8 MiB tiles: per-step overhead (~0.35 us) < ~7% even on v7x HBM.
        target_tile_bytes = min(8 * _MiB, vmem_limit_bytes // 6)
    min_tile_bytes = min(2 * _MiB, target_tile_bytes)

    x_flat = x.reshape(N, C, HW)
    w1_t = jnp.transpose(w1)            # (C, C_red)
    w2_t = jnp.transpose(w2)            # (C_red, C)
    b1_2d = b1.reshape(1, C_red)
    b2_2d = b2.reshape(1, C)

    per_batch = C * HW * itemsize       # bytes of one batch element's (C, HW) slab

    # Fallback when even nb=1 can't double-buffer in+out within the budget
    # (happens earliest on v7x, 64 MiB physical VMEM).
    use_hw_tiled = force_hw_tiled or (per_batch * 5 > vmem_limit_bytes)

    if not use_hw_tiled:
        # ---------------- fused single-pass path (1 read + 1 write of x) ----
        nb = max(1, min(N, target_tile_bytes // per_batch))
        min_nb = max(1, min_tile_bytes // per_batch)
        if N >= 4:
            # >=4 grid steps (>=2 per v7x TensorCore) when N allows, but never
            # shrink the tile below ~2 MiB.
            nb = min(nb, max(N // 4, min_nb))
        elif N >= 2:
            nb = min(nb, max(N // 2, min_nb))
        grid = (pl.cdiv(N, nb),)        # ragged last batch block is fine

        inv_hw = 1.0 / HW

        def kernel(x_ref, w1_ref, b1_ref, w2_ref, b2_ref, o_ref):
            _fused_kernel(x_ref, w1_ref, b1_ref, w2_ref, b2_ref, o_ref,
                          inv_hw=inv_hw)

        out_flat = pl.pallas_call(
            kernel,
            out_shape=jax.ShapeDtypeStruct((N, C, HW), x.dtype),
            grid_spec=pltpu.PrefetchScalarGridSpec(
                num_scalar_prefetch=0,
                grid=grid,
                in_specs=[
                    pl.BlockSpec((nb, C, HW), lambda n: (n, 0, 0)),
                    pl.BlockSpec((C, C_red), lambda n: (0, 0)),
                    pl.BlockSpec((1, C_red), lambda n: (0, 0)),
                    pl.BlockSpec((C_red, C), lambda n: (0, 0)),
                    pl.BlockSpec((1, C), lambda n: (0, 0)),
                ],
                out_specs=pl.BlockSpec((nb, C, HW), lambda n: (n, 0, 0)),
            ),
            compiler_params=pltpu.CompilerParams(
                dimension_semantics=("parallel",),
                vmem_limit_bytes=int(vmem_limit_bytes),
            ),
        )(x_flat, w1_t, b1_2d, w2_t, b2_2d)
        return out_flat.reshape(N, C, H, W)

    # ---------------- HW-tiled two-pass fallback (2 reads + 1 write of x) ---
    # Pass 1: accumulate the channel sums over HW chunks, then compute the
    #         gate at the last chunk. Pass 2: apply the gate chunk by chunk.
    hw_t = (target_tile_bytes // (C * itemsize)) // 128 * 128
    hw_t = max(128, hw_t)
    if hw_t >= HW:
        hw_t = HW                        # full-dim block (always legal)
    n_hw = pl.cdiv(HW, hw_t)
    nb = 1

    def gate_kernel(x_ref, w1_ref, b1_ref, w2_ref, b2_ref, g_ref, acc_ref):
        hw_i = pl.program_id(1)

        @pl.when(hw_i == 0)
        def _():
            acc_ref[...] = jnp.zeros_like(acc_ref)

        x_blk = x_ref[...]                                           # (nb, C, hw_t)
        # Mask lanes past the true HW on the ragged last HW block so the mean
        # denominator stays exact (the HW axis is the reduction axis).
        lane = lax.broadcasted_iota(jnp.int32, x_blk.shape, 2) + hw_i * hw_t
        x_blk = jnp.where(lane < HW, x_blk, jnp.zeros_like(x_blk))
        acc_ref[...] += jnp.sum(x_blk, axis=2, dtype=jnp.float32)

        @pl.when(hw_i == pl.num_programs(1) - 1)
        def _():
            s = acc_ref[...] * jnp.float32(1.0 / HW)                 # (nb, C)
            h = jnp.dot(s, w1_ref[...], preferred_element_type=jnp.float32) + b1_ref[...]
            h = jnp.maximum(h, 0.0)
            z = jnp.dot(h, w2_ref[...], preferred_element_type=jnp.float32) + b2_ref[...]
            g_ref[...] = jax.nn.sigmoid(z)[:, None, :]               # (nb, 1, C)

    gate = pl.pallas_call(
        gate_kernel,
        out_shape=jax.ShapeDtypeStruct((N, 1, C), jnp.float32),
        grid_spec=pltpu.PrefetchScalarGridSpec(
            num_scalar_prefetch=0,
            grid=(N, n_hw),
            in_specs=[
                pl.BlockSpec((nb, C, hw_t), lambda n, h: (n, 0, h)),
                pl.BlockSpec((C, C_red), lambda n, h: (0, 0)),
                pl.BlockSpec((1, C_red), lambda n, h: (0, 0)),
                pl.BlockSpec((C_red, C), lambda n, h: (0, 0)),
                pl.BlockSpec((1, C), lambda n, h: (0, 0)),
            ],
            out_specs=pl.BlockSpec((nb, 1, C), lambda n, h: (n, 0, 0)),
            scratch_shapes=[pltpu.VMEM((nb, C), jnp.float32)],
        ),
        compiler_params=pltpu.CompilerParams(
            dimension_semantics=("parallel", "arbitrary"),
            vmem_limit_bytes=int(vmem_limit_bytes),
        ),
    )(x_flat, w1_t, b1_2d, w2_t, b2_2d)

    def scale_kernel(x_ref, g_ref, o_ref):
        x_blk = x_ref[...]                                           # (nb, C, hw_t)
        g = g_ref[...][:, 0, :]                                      # (nb, C) f32
        o_ref[...] = (x_blk * g.astype(x_blk.dtype)[:, :, None]).astype(o_ref.dtype)

    out_flat = pl.pallas_call(
        scale_kernel,
        out_shape=jax.ShapeDtypeStruct((N, C, HW), x.dtype),
        grid_spec=pltpu.PrefetchScalarGridSpec(
            num_scalar_prefetch=0,
            grid=(N, n_hw),
            in_specs=[
                pl.BlockSpec((nb, C, hw_t), lambda n, h: (n, 0, h)),
                pl.BlockSpec((nb, 1, C), lambda n, h: (n, 0, 0)),
            ],
            out_specs=pl.BlockSpec((nb, C, hw_t), lambda n, h: (n, 0, h)),
        ),
        compiler_params=pltpu.CompilerParams(
            dimension_semantics=("parallel", "parallel"),
            vmem_limit_bytes=int(vmem_limit_bytes),
        ),
    )(x_flat, gate)
    return out_flat.reshape(N, C, H, W)


def se_reference(x, w1, b1, w2, b2):
    """Pure-JAX reference mirroring the PyTorch forward (f32 math)."""
    xf = x.astype(jnp.float32)
    s = jnp.mean(xf, axis=(2, 3))                                   # (N, C)
    h = jnp.maximum(jnp.einsum("rc,nc->nr", w1.astype(jnp.float32), s) + b1, 0.0)
    g = jax.nn.sigmoid(jnp.einsum("cr,nr->nc", w2.astype(jnp.float32), h) + b2)
    return xf * g[:, :, None, None]


if __name__ == "__main__":
    # TPU-friendly small shapes: C multiple of 8, H*W multiple of 128
    # (lane-dense output stores), channels divisible by reduction=3.
    # TODO(synk): for real SE shapes with tiny HW (e.g. 7x7=49) a channel-last
    # (N, HW, C) layout would keep output stores lane-dense; not needed here.
    N, C, H, W = 4, 24, 16, 16
    reduction = 3
    C_red = C // reduction

    key = jax.random.PRNGKey(0)
    kx, kw1, kb1, kw2, kb2 = jax.random.split(key, 5)

    x = jax.random.normal(kx, (N, C, H, W), dtype=jnp.float32)
    # 1x1 conv weights (kernel dims squeezed): Conv2d(C, C_red, 1) -> (C_red, C)
    w1 = jax.random.normal(kw1, (C_red, C), dtype=jnp.float32) * 0.1
    b1 = jax.random.normal(kb1, (C_red,), dtype=jnp.float32) * 0.1
    # Conv2d(C_red, C, 1) -> (C, C_red)
    w2 = jax.random.normal(kw2, (C, C_red), dtype=jnp.float32) * 0.1
    b2 = jax.random.normal(kb2, (C,), dtype=jnp.float32) * 0.1

    ref = se_reference(x, w1, b1, w2, b2)

    # 1) Fused single-pass path, f32.
    out = jax.block_until_ready(se_module(x, w1, b1, w2, b2))
    assert out.shape == (N, C, H, W)
    assert jnp.allclose(out, ref, atol=3e-5, rtol=1e-5), "fused f32 mismatch"

    # 2) Fused path, bf16 input (gate rounded to bf16 before the multiply).
    out_bf16 = jax.block_until_ready(
        se_module(x.astype(jnp.bfloat16), w1, b1, w2, b2))
    ref_bf16 = se_reference(x.astype(jnp.bfloat16), w1, b1, w2, b2)
    assert jnp.allclose(out_bf16.astype(jnp.float32), ref_bf16,
                        atol=6e-2, rtol=6e-2), "fused bf16 mismatch"

    # 3) Fused path with a ragged last batch block (N=5, nb=2 -> 3 grid steps).
    x5 = jax.random.normal(kx, (5, C, H, W), dtype=jnp.float32)
    per_batch = C * H * W * 4
    out5 = jax.block_until_ready(
        se_module(x5, w1, b1, w2, b2, target_tile_bytes=2 * per_batch))
    ref5 = se_reference(x5, w1, b1, w2, b2)
    assert jnp.allclose(out5, ref5, atol=3e-5, rtol=1e-5), "ragged-batch mismatch"

    # 4) HW-tiled two-pass fallback (forced; hw_t=128 -> 2 HW chunks).
    out_hw = jax.block_until_ready(
        se_module(x, w1, b1, w2, b2, force_hw_tiled=True,
                  target_tile_bytes=12 * 1024))
    assert jnp.allclose(out_hw, ref, atol=3e-5, rtol=1e-5), "hw-tiled mismatch"

    print("KERNEL_OK")
</pallas_src>

<mosaic_0001>
module attributes {stable_mosaic.version = 11 : i64} {
  func.func @kernel(%arg0: i32, %arg1: memref<4x24x256xf32, #tpu.memory_space<vmem>>, %arg2: memref<24x8xf32, #tpu.memory_space<vmem>>, %arg3: memref<1x8xf32, #tpu.memory_space<vmem>>, %arg4: memref<8x24xf32, #tpu.memory_space<vmem>>, %arg5: memref<1x24xf32, #tpu.memory_space<vmem>>, %arg6: memref<4x24x256xf32, #tpu.memory_space<vmem>>) attributes {dimension_semantics = [#tpu.dimension_semantics<parallel>], iteration_bounds = array<i64: 1>, scalar_prefetch = 0 : i64, scratch_operands = 0 : i64, tpu.core_type = #tpu.core_type<tc>, window_params = [{transform_indices = @transform_0, window_bounds = array<i64: 4, 24, 256>}, {pipeline_mode = #tpu.pipeline_mode<synchronous>, transform_indices = @transform_1, window_bounds = array<i64: 24, 8>}, {pipeline_mode = #tpu.pipeline_mode<synchronous>, transform_indices = @transform_2, window_bounds = array<i64: 1, 8>}, {pipeline_mode = #tpu.pipeline_mode<synchronous>, transform_indices = @transform_3, window_bounds = array<i64: 8, 24>}, {pipeline_mode = #tpu.pipeline_mode<synchronous>, transform_indices = @transform_4, window_bounds = array<i64: 1, 24>}, {transform_indices = @transform_5, window_bounds = array<i64: 4, 24, 256>}]} {
    %c0 = arith.constant 0 : index
    %c0_0 = arith.constant 0 : index
    %c0_1 = arith.constant 0 : index
    %0 = vector.load %arg1[%c0, %c0_0, %c0_1] : memref<4x24x256xf32, #tpu.memory_space<vmem>>, vector<4x24x256xf32>
    %cst = arith.constant dense<0.000000e+00> : vector<4x24xf32>
    %1 = vector.multi_reduction <add>, %0, %cst [2] : vector<4x24x256xf32> to vector<4x24xf32>
    %cst_2 = arith.constant 3.906250e-03 : f32
    %2 = vector.broadcast %cst_2 : f32 to vector<4x24xf32>
    %3 = arith.mulf %1, %2 : vector<4x24xf32>
    %c0_3 = arith.constant 0 : index
    %c0_4 = arith.constant 0 : index
    %4 = vector.load %arg2[%c0_3, %c0_4] : memref<24x8xf32, #tpu.memory_space<vmem>>, vector<24x8xf32>
    %cst_5 = arith.constant dense<0.000000e+00> : vector<4x8xf32>
    %5 = tpu.matmul %3, %4, %cst_5 {dimension_numbers = #tpu.dot_dimension_numbers<[1], [0], [0], [1], [0, 0, 1, 1], [], []>} : vector<4x24xf32>, vector<24x8xf32>, vector<4x8xf32> -> vector<4x8xf32>
    %c0_6 = arith.constant 0 : index
    %c0_7 = arith.constant 0 : index
    %6 = vector.load %arg3[%c0_6, %c0_7] : memref<1x8xf32, #tpu.memory_space<vmem>>, vector<1x8xf32>
    %7 = vector.broadcast %6 : vector<1x8xf32> to vector<4x8xf32>
    %8 = arith.addf %5, %7 : vector<4x8xf32>
    %cst_8 = arith.constant 0.000000e+00 : f32
    %9 = vector.broadcast %cst_8 : f32 to vector<4x8xf32>
    %10 = arith.maximumf %8, %9 : vector<4x8xf32>
    %c0_9 = arith.constant 0 : index
    %c0_10 = arith.constant 0 : index
    %11 = vector.load %arg4[%c0_9, %c0_10] : memref<8x24xf32, #tpu.memory_space<vmem>>, vector<8x24xf32>
    %cst_11 = arith.constant dense<0.000000e+00> : vector<4x24xf32>
    %12 = tpu.matmul %10, %11, %cst_11 {dimension_numbers = #tpu.dot_dimension_numbers<[1], [0], [0], [1], [0, 0, 1, 1], [], []>} : vector<4x8xf32>, vector<8x24xf32>, vector<4x24xf32> -> vector<4x24xf32>
    %c0_12 = arith.constant 0 : index
    %c0_13 = arith.constant 0 : index
    %13 = vector.load %arg5[%c0_12, %c0_13] : memref<1x24xf32, #tpu.memory_space<vmem>>, vector<1x24xf32>
    %14 = vector.broadcast %13 : vector<1x24xf32> to vector<4x24xf32>
    %15 = arith.addf %12, %14 : vector<4x24xf32>
    %16 = arith.negf %15 : vector<4x24xf32>
    %17 = math.exp %16 : vector<4x24xf32>
    %cst_14 = arith.constant 1.000000e+00 : f32
    %18 = vector.broadcast %cst_14 : f32 to vector<4x24xf32>
    %19 = arith.addf %18, %17 : vector<4x24xf32>
    %20 = arith.divf %18, %19 : vector<4x24xf32>
    %21 = vector.shape_cast %20 : vector<4x24xf32> to vector<4x24x1xf32>
    %22 = vector.broadcast %21 : vector<4x24x1xf32> to vector<4x24x256xf32>
    %23 = arith.mulf %0, %22 : vector<4x24x256xf32>
    %c0_15 = arith.constant 0 : index
    %c0_16 = arith.constant 0 : index
    %c0_17 = arith.constant 0 : index
    %24 = vector.load %arg6[%c0_15, %c0_16, %c0_17] : memref<4x24x256xf32, #tpu.memory_space<vmem>>, vector<4x24x256xf32>
    tpu.vector_store %arg6[%c0_15, %c0_16, %c0_17], %23 {strides = array<i32>} : memref<4x24x256xf32, #tpu.memory_space<vmem>>, vector<4x24x256xf32>,
    return
  }
  func.func @transform_0(%arg0: i32) -> (i32, i32, i32) {
    %c0_i32 = arith.constant 0 : i32
    %c0_i32_0 = arith.constant 0 : i32
    %c0_i32_1 = arith.constant 0 : i32
    return %arg0, %c0_i32, %c0_i32_0 : i32, i32, i32
  }
  func.func @transform_1(%arg0: i32) -> (i32, i32) {
    %c0_i32 = arith.constant 0 : i32
    %c0_i32_0 = arith.constant 0 : i32
    %c0_i32_1 = arith.constant 0 : i32
    return %c0_i32, %c0_i32_0 : i32, i32
  }
  func.func @transform_2(%arg0: i32) -> (i32, i32) {
    %c0_i32 = arith.constant 0 : i32
    %c0_i32_0 = arith.constant 0 : i32
    %c0_i32_1 = arith.constant 0 : i32
    return %c0_i32, %c0_i32_0 : i32, i32
  }
  func.func @transform_3(%arg0: i32) -> (i32, i32) {
    %c0_i32 = arith.constant 0 : i32
    %c0_i32_0 = arith.constant 0 : i32
    %c0_i32_1 = arith.constant 0 : i32
    return %c0_i32, %c0_i32_0 : i32, i32
  }
  func.func @transform_4(%arg0: i32) -> (i32, i32) {
    %c0_i32 = arith.constant 0 : i32
    %c0_i32_0 = arith.constant 0 : i32
    %c0_i32_1 = arith.constant 0 : i32
    return %c0_i32, %c0_i32_0 : i32, i32
  }
  func.func @transform_5(%arg0: i32) -> (i32, i32, i32) {
    %c0_i32 = arith.constant 0 : i32
    %c0_i32_0 = arith.constant 0 : i32
    %c0_i32_1 = arith.constant 0 : i32
    return %arg0, %c0_i32, %c0_i32_0 : i32, i32, i32
  }
}

</mosaic_0001>

<bundles_post_ra>
// kernel: tpu_custom_call.1
= control target key start
LH: loop header
LB: loop body
LE: loop exit
PB: predicated region body
PF: predicated region fallthrough
CT: control target
= control target key end

     0   :  { %10 = vsyncpa [#allocation3], 0  ;;  %s769_s0 = inlined_call_operand.hbm [shape: f32[4,24,256], index: 0, kind: input, shape index: {}]   ;;  %s770_s1 = inlined_call_operand.vmem [shape: f32[24,8], index: 1, kind: input, shape index: {}]   ;;  %s771_s2 = inlined_call_operand.vmem [shape: f32[1,8], index: 2, kind: input, shape index: {}]   ;;  %s772_s3 = inlined_call_operand.vmem [shape: f32[8,24], index: 3, kind: input, shape index: {}]   ;;  %s773_s4 = inlined_call_operand.vmem [shape: f32[1,24], index: 4, kind: input, shape index: {}]   ;;  %s774_s5 = inlined_call_operand.hbm [shape: f32[4,24,256], index: 5, kind: output, shape index: {}]  }
   0x1   :  { %11 = vsyncpa [#allocation4], 0  ;;  %s571_s18 = smov [#allocation2]   ;;  %s523_s22 = scalar_lea.hbm %s769_s0, 3072 }
   0x2   :  { %s17_s19 = sshll.u32 %s571_s18, 4  ;;  %p524_p0 = scmp.ne.s32.totalorder %s769_s0, %s523_s22  ;;  %s18_s19 = int_to_ptr.vmem [resolvable:$true] %s17_s19 }
   0x3   :  { %p527_p1 = scmp.lt.u32.totalorder %s523_s22, %s769_s0 }
   0x5   :  { %p529_p2 = pnand %p527_p1, %p524_p0 }
   0x7   :  { %532 = shalt.err (!%p529_p2)
}
   0x8   :  { %s533_s27 = scalar_lea.vmem %s18_s19, 3072  ;;  %p538_p4 = scmp.lt.s32.totalorder %s18_s19, %s18_s19 }
   0x9   :  { %p534_p3 = scmp.ne.s32.totalorder %s18_s19, %s533_s27  ;;  %p539_p5 = scmp.lt.s32.totalorder %s533_s27, %s533_s27 }
   0xb   :  { %p540_p6 = por %p539_p5, %p538_p4 }
   0xd   :  { %p541_p7 = pnand %p540_p6, %p534_p3 }
   0xf   :  { %544 = shalt.err (!%p541_p7)
}
  0x10   :  { %s572_s28 = smov 256   ;;  %s573_s29 = smov 16  }
  0x11   :  { %23 = dma.hbm_to_vmem [thread:$0]  %s769_s0, 3072, %s18_s19, [#allocation3], %s572_s28, %s572_s28, %s573_s29  }
  0x12   :  { %567 = dma.done.wait [#allocation3], 3072  }
  0x13   :  { %568 = vsyncadd [#allocation3], 4294964224  ;;  %v623_v0 = vld [vmem:[#allocation2 + $0x30] sm:$0xff]  ;;  %v625_v1 = vld [vmem:[#allocation2 + $0x38] sm:$0xff]  ;;  %v574_v39 = vmov 0.0|0.0   ;;  %v575_v41 = vmov 0.0   ;;  %v129_v44 = vlaneseq }
  0x14   :  { %v627_v2 = vld [vmem:[#allocation2] sm:$0xff]  ;;  %v68_v3 = vadd.f32 %v625_v1, %v623_v0  ;;  %v631_v4 = vld [vmem:[#allocation2 + $0x8] sm:$0xff]  ;;  %v639_v8 = vld [vmem:[#allocation2 + $0x10] sm:$0xff]  ;;  %509 = vmatprep.subr.bf16.mxu0 %v574_v39  ;;  %vm576_vm0 = vmmov 0   ;;  %504 = vmatprep.subr.mxu1 %v575_v41  ;;  %vm140_vm1 = vcmask 130112   ;;  %vm147_vm2 = vcmask 195712  }
  0x15   :  { %v633_v5 = vld [vmem:[#allocation2 + $0x40] sm:$0xff]  ;;  %v635_v6 = vld [vmem:[#allocation2 + $0x48] sm:$0xff]  ;;  %v59_v7 = vadd.f32 %v631_v4, %v627_v2  ;;  %v641_v9 = vld [vmem:[#allocation2 + $0x18] sm:$0xff]  ;;  %501 = vmatprep.mubr.msk.f32.mxu0 %vm576_vm0, %v575_v41  ;;  %506 = vmatprep.mubr.msk.f32.mxu1 %vm576_vm0, %v575_v41  ;;  %v130_v47 = vand.u32 127, %v129_v44  ;;  %v704_v52 = vshrl.u32 %v129_v44, 7  ;;  %vm191_vm3 = vcmask 1041409  }
  0x16   :  { %69 = vadd.xlane.f32.xlu1 %v68_v3  ;;  %v71_v10 = vadd.f32 %v635_v6, %v633_v5  ;;  %v62_v11 = vadd.f32 %v641_v9, %v639_v8  ;;  %v647_v12 = vld [vmem:[#allocation2 + $0x50] sm:$0xff]  ;;  %v649_v13 = vld [vmem:[#allocation2 + $0x58] sm:$0xff]  ;;  %v651_v14 = vld [vmem:[#allocation2 + $0x20] sm:$0xff]  ;;  %vm193_vm4 = vcmask 1042434   ;;  %vm195_vm5 = vcmask 1043459  }
  0x17   :  { %60 = vadd.xlane.f32.xlu0 %v59_v7  ;;  %v653_v15 = vld [vmem:[#allocation2 + $0x28] sm:$0xff]  ;;  %v74_v16 = vadd.f32 %v649_v13, %v647_v12  ;;  %v659_v18 = vld [vmem:[#allocation2 + $0x70] sm:$0xff]  ;;  %v661_v19 = vld [vmem:[#allocation2 + $0x78] sm:$0xff]  ;;  %v135_v50 = vadd.s32 4294967288, %v130_v47  ;;  %v142_v51 = vadd.s32 4294967280, %v130_v47  ;;  %v133_v63 = vsub.s32 %v130_v47, %v704_v52 }
  0x18   :  { %v65_v17 = vadd.f32 %v653_v15, %v651_v14  ;;  %v663_v20 = vld [vmem:[#allocation2 + $0x60] sm:$0xff]  ;;  %v665_v21 = vld [vmem:[#allocation2 + $0x68] sm:$0xff]  ;;  %v80_v22 = vadd.f32 %v661_v19, %v659_v18  ;;  %v671_v24 = vld [vmem:[#allocation2 + $0x90] sm:$0xff]  ;;  %vm197_vm6 = vcmask 195584   ;;  %vm279_vm7 = vcmask 64512  }
  0x19   :  { %v77_v23 = vadd.f32 %v665_v21, %v663_v20  ;;  %v673_v25 = vld [vmem:[#allocation2 + $0x98] sm:$0xff]  ;;  %v675_v26 = vld [vmem:[#allocation2 + $0x80] sm:$0xff]  ;;  %v677_v27 = vld [vmem:[#allocation2 + $0x88] sm:$0xff]  ;;  %v138_v55 = vsub.s32 %v135_v50, %v704_v52  ;;  %v145_v58 = vsub.s32 %v142_v51, %v704_v52 }
  0x1a   :  { %72 = vadd.xlane.f32.xlu1 %v71_v10  ;;  %v86_v28 = vadd.f32 %v673_v25, %v671_v24  ;;  %v83_v29 = vadd.f32 %v677_v27, %v675_v26  ;;  %v683_v30 = vld [vmem:[#allocation2 + $0xb0] sm:$0xff]  ;;  %v685_v31 = vld [vmem:[#allocation2 + $0xb8] sm:$0xff]  ;;  %v687_v32 = vld [vmem:[#allocation2 + $0xa0] sm:$0xff] }
  0x1b   :  { %63 = vadd.xlane.f32.xlu0 %v62_v11  ;;  %v689_v33 = vld [vmem:[#allocation2 + $0xa8] sm:$0xff]  ;;  %v92_v34 = vadd.f32 %v685_v31, %v683_v30  ;;  %v107_v36 = vld [vmem:[%s770_s1] sm:$0xff]  ;;  %v109_v40 = vld [vmem:[%s770_s1 + $0x10] sm:$0xff] }
  0x1c   :  { %v89_v35 = vadd.f32 %v689_v33, %v687_v32  ;;  %v108_v37 = vld [vmem:[%s770_s1 + $0x8] sm:$0xff] }
  0x1d   :  { %v510_v38 = vpack.c.bf16 %v108_v37, %v107_v36 }
  0x1e   :  { %75 = vadd.xlane.f32.xlu1 %v74_v16 }
  0x1f   :  { %66 = vadd.xlane.f32.xlu0 %v65_v17  ;;  %511 = vmatpush3.bf16.msra.mxu0 %v510_v38 }
  0x20   :  { %499 = vmatprep.subr.mxu0 %v575_v41 }
  0x22   :  { %81 = vadd.xlane.f32.xlu1 %v80_v22 }
  0x23   :  { %78 = vadd.xlane.f32.xlu0 %v77_v23  ;;  %500 = vmatpush3.msra.mxu0 %v109_v40 }
  0x26   :  { %87 = vadd.xlane.f32.xlu1 %v86_v28 }
  0x27   :  { %84 = vadd.xlane.f32.xlu0 %v83_v29 }
  0x2a   :  { %93 = vadd.xlane.f32.xlu1 %v92_v34 }
  0x2b   :  { %90 = vadd.xlane.f32.xlu0 %v89_v35 }
  0xa3   :  { %v70_v42 = vpop.xlane.xlu1 %69 }
  0xa4   :  { %v61_v43 = vpop.xlane.xlu0 %60  ;;  %v98_v3 = vmul.f32 0.00390625, %v70_v42 }
  0xa5   :  { %v95_v7 = vmul.f32 0.00390625, %v61_v43 }
  0xa6   :  { %v152_v35 = vrot.slane %v98_v3, %v133_v63  ;;  %v486_v3 = vld [vmem:[%s773_s4] ss:$0 sm:$0xff] }
  0xa7   :  { %v73_v45 = vpop.xlane.xlu1 %72  ;;  %v134_v36 = vrot.slane %v95_v7, %v133_v63 }
  0xa8   :  { %v64_v46 = vpop.xlane.xlu0 %63  ;;  %v99_v56 = vmul.f32 0.00390625, %v73_v45 }
  0xa9   :  { %v96_v57 = vmul.f32 0.00390625, %v64_v46 }
  0xaa   :  { %v156_v16 = vrot.slane %v99_v56, %v138_v55 }
  0xab   :  { %v76_v48 = vpop.xlane.xlu1 %75  ;;  %v139_v17 = vrot.slane %v96_v57, %v138_v55 }
  0xac   :  { %v67_v49 = vpop.xlane.xlu0 %66  ;;  %v100_v59 = vmul.f32 0.00390625, %v76_v48  ;;  %v157_v42 = vsel %vm140_vm1, %v156_v16, %v152_v35 }
  0xad   :  { %v97_v60 = vmul.f32 0.00390625, %v67_v49  ;;  %v141_v43 = vsel %vm140_vm1, %v139_v17, %v134_v36  ;;  %v391_v36 = vsub.s32 2, %v704_v52 }
  0xae   :  { %v161_v23 = vrot.slane %v100_v59, %v145_v58 }
  0xaf   :  { %v82_v53 = vpop.xlane.xlu1 %81  ;;  %v146_v28 = vrot.slane %v97_v60, %v145_v58  ;;  %v271_v60 = vld [vmem:[%s772_s3] sm:$0xff] }
  0xb0   :  { %v79_v54 = vpop.xlane.xlu0 %78  ;;  %v102_v61 = vmul.f32 0.00390625, %v82_v53  ;;  %v162_v45 = vsel %vm147_vm2, %v161_v23, %v157_v42  ;;  %505 = vmatpush3.msra.mxu1 %v271_v60  ;;  %v361_v23 = vsub.s32 0, %v704_v52 }
  0xb1   :  { %v101_v62 = vmul.f32 0.00390625, %v79_v54  ;;  %v148_v46 = vsel %vm147_vm2, %v146_v28, %v141_v43 }
  0xb2   :  { %v170_v29 = vrot.slane %v102_v61, %v138_v55  ;;  %v192_v54 = vsel %vm191_vm3, %v162_v45, %v148_v46 }
  0xb3   :  { %v88_v10 = vpop.xlane.xlu1 %87  ;;  %v166_v34 = vrot.slane %v101_v62, %v133_v63 }
  0xb4   :  { %v85_v11 = vpop.xlane.xlu0 %84  ;;  %v104_v38 = vmul.f32 0.00390625, %v88_v10 }
  0xb5   :  { %v103_v22 = vmul.f32 0.00390625, %v85_v11  ;;  %v171_v47 = vsel %vm140_vm1, %v170_v29, %v166_v34  ;;  %v376_v34 = vsub.s32 1, %v704_v52 }
  0xb6   :  { %v180_v50 = vrot.slane %v104_v38, %v133_v63  ;;  %v406_v38 = vsub.s32 3, %v704_v52 }
  0xb7   :  { %v175_v37 = vrot.slane %v103_v22, %v145_v58  ;;  %v94_v39 = vpop.xlane.xlu1 %93 }
  0xb8   :  { %v91_v40 = vpop.xlane.xlu0 %90  ;;  %v106_v41 = vmul.f32 0.00390625, %v94_v39 }
  0xb9   :  { %v105_v44 = vmul.f32 0.00390625, %v91_v40  ;;  %v176_v49 = vsel %vm147_vm2, %v175_v37, %v171_v47 }
  0xba   :  { %v189_v48 = vrot.slane %v106_v41, %v145_v58  ;;  %v194_v57 = vsel %vm193_vm4, %v176_v49, %v192_v54 }
  0xbb   :  { %v184_v51 = vrot.slane %v105_v44, %v138_v55  ;;  %v484_v55 = vld [vmem:[%s771_s2] ss:$0 sm:$0xff]  ;;  %s577_s2 = smov [#allocation5]  }
  0xbc   :  { %s472_s3 = sshll.u32 %s577_s2, 4  ;;  %s473_s3 = int_to_ptr.vmem [resolvable:$true] %s472_s3 }
  0xbd   :  { %v185_v53 = vsel %vm140_vm1, %v184_v51, %v180_v50  ;;  %s545_s4 = scalar_lea.vmem %s473_s3, 3072  ;;  %p550_p9 = scmp.lt.s32.totalorder %s473_s3, %s473_s3 }
  0xbe   :  { %v190_v56 = vsel %vm147_vm2, %v189_v48, %v185_v53  ;;  %p546_p8 = scmp.ne.s32.totalorder %s473_s3, %s545_s4  ;;  %p551_p10 = scmp.lt.s32.totalorder %s545_s4, %s545_s4 }
  0xbf   :  { %v196_v59 = vsel %vm195_vm5, %v190_v56, %v194_v57 }
  0xc0   :  { %502 = vmatmul.mubr.msk.f32.vlgmr.msra.gmra.mrb[0].mxu0 %vm197_vm6, %v196_v59  ;;  %p552_p11 = por %p551_p10, %p550_p9 }
  0xc2   :  { %p553_p12 = pnand %p552_p11, %p546_p8 }
 0x193   :  { %v266_v58 = vpop.f32.mrb[0].mxu0 }
 0x194   :  { %v267_v61 = vadd.f32 %v484_v55, %v266_v58  ;;  %v503_v62 = vpop.f32.mrb[1].mxu0 }
 0x196   :  { %v270_v63 = vmax.f32 %v267_v61, 0.0 }
 0x198   :  { %507 = vmatmul.mubr.msk.f32.vlgmr.msra.gmra.mrb[0].mxu1 %vm279_vm7, %v270_v63 }
 0x26b   :  { %v349_v7 = vpop.f32.mrb[0].mxu1 }
 0x26c   :  { %v350_v10 = vadd.f32 %v486_v3, %v349_v7  ;;  %v508_v11 = vpop.f32.mrb[1].mxu1 }
 0x26e   :  { %v488_v16 = vmul.f32 -1.442695, %v350_v10 }
 0x270   :  { %519 = vpow2.f32 %v488_v16 }
 0x27a   :  { %v520_v17 = vpop.eup %519 }
 0x27b   :  { %v356_v22 = vadd.f32 1.0, %v520_v17 }
 0x27d   :  { %521 = vrcp.f32 %v356_v22 }
 0x287   :  { %v522_v28 = vpop.eup %521 }
 0x288   :  { %v362_v29 = vrot.slane %v522_v28, %v361_v23  ;;  %v377_v35 = vrot.slane %v522_v28, %v376_v34  ;;  %v392_v37 = vrot.slane %v522_v28, %v391_v36  ;;  %v407_v39 = vrot.slane %v522_v28, %v406_v38 }
 0x28a   :  { %368 = vbcast.lane.b32.xlu1 %v362_v29, 264  ;;  %364 = vbcast.lane.b32.xlu0 %v362_v29, 256 }
 0x28e   :  { %372 = vbcast.lane.b32.xlu1 %v362_v29, 272  ;;  %383 = vbcast.lane.b32.xlu0 %v377_v35, 264 }
 0x292   :  { %379 = vbcast.lane.b32.xlu1 %v377_v35, 256  ;;  %394 = vbcast.lane.b32.xlu0 %v392_v37, 256 }
 0x296   :  { %387 = vbcast.lane.b32.xlu1 %v377_v35, 272  ;;  %402 = vbcast.lane.b32.xlu0 %v392_v37, 272 }
 0x29a   :  { %398 = vbcast.lane.b32.xlu1 %v392_v37, 264  ;;  %413 = vbcast.lane.b32.xlu0 %v407_v39, 264 }
 0x29e   :  { %409 = vbcast.lane.b32.xlu1 %v407_v39, 256 }
 0x2a2   :  { %417 = vbcast.lane.b32.xlu1 %v407_v39, 272 }
 0x2fc   :  { %v369_v40 = vpop.permute.xlu1 %368  ;;  %v365_v41 = vpop.permute.xlu0 %364 }
 0x2fd   :  { %v421_v42 = vmul.f32 %v369_v40, %v639_v8  ;;  %v422_v43 = vmul.f32 %v369_v40, %v641_v9  ;;  %v419_v44 = vmul.f32 %v365_v41, %v627_v2  ;;  %v420_v45 = vmul.f32 %v365_v41, %v631_v4 }
 0x2ff   :  { %445 = vst [vmem:[#allocation5 + $0x10] sm:$0xff] %v421_v42  ;;  %446 = vst [vmem:[#allocation5 + $0x18] sm:$0xff] %v422_v43 }
 0x300   :  { %443 = vst [vmem:[#allocation5] sm:$0xff] %v419_v44  ;;  %444 = vst [vmem:[#allocation5 + $0x8] sm:$0xff] %v420_v45  ;;  %v373_v52 = vpop.permute.xlu1 %372  ;;  %v384_v46 = vpop.permute.xlu0 %383 }
 0x301   :  { %v423_v47 = vmul.f32 %v373_v52, %v651_v14  ;;  %v424_v48 = vmul.f32 %v373_v52, %v653_v15  ;;  %v427_v49 = vmul.f32 %v384_v46, %v633_v5  ;;  %v428_v8 = vmul.f32 %v384_v46, %v635_v6 }
 0x303   :  { %447 = vst [vmem:[#allocation5 + $0x20] sm:$0xff] %v423_v47  ;;  %448 = vst [vmem:[#allocation5 + $0x28] sm:$0xff] %v424_v48 }
 0x304   :  { %451 = vst [vmem:[#allocation5 + $0x40] sm:$0xff] %v427_v49  ;;  %452 = vst [vmem:[#allocation5 + $0x48] sm:$0xff] %v428_v8  ;;  %v380_v2 = vpop.permute.xlu1 %379  ;;  %v395_v4 = vpop.permute.xlu0 %394 }
 0x305   :  { %v425_v9 = vmul.f32 %v380_v2, %v623_v0  ;;  %v426_v50 = vmul.f32 %v380_v2, %v625_v1  ;;  %v431_v51 = vmul.f32 %v395_v4, %v663_v20  ;;  %v432_v14 = vmul.f32 %v395_v4, %v665_v21 }
 0x307   :  { %449 = vst [vmem:[#allocation5 + $0x30] sm:$0xff] %v425_v9  ;;  %450 = vst [vmem:[#allocation5 + $0x38] sm:$0xff] %v426_v50 }
 0x308   :  { %455 = vst [vmem:[#allocation5 + $0x60] sm:$0xff] %v431_v51  ;;  %456 = vst [vmem:[#allocation5 + $0x68] sm:$0xff] %v432_v14  ;;  %v388_v5 = vpop.permute.xlu1 %387  ;;  %v403_v6 = vpop.permute.xlu0 %402 }
 0x309   :  { %v429_v15 = vmul.f32 %v388_v5, %v647_v12  ;;  %v430_v53 = vmul.f32 %v388_v5, %v649_v13  ;;  %v435_v54 = vmul.f32 %v403_v6, %v675_v26  ;;  %v436_v0 = vmul.f32 %v403_v6, %v677_v27 }
 0x30b   :  { %453 = vst [vmem:[#allocation5 + $0x50] sm:$0xff] %v429_v15  ;;  %454 = vst [vmem:[#allocation5 + $0x58] sm:$0xff] %v430_v53 }
 0x30c   :  { %459 = vst [vmem:[#allocation5 + $0x80] sm:$0xff] %v435_v54  ;;  %460 = vst [vmem:[#allocation5 + $0x88] sm:$0xff] %v436_v0  ;;  %v399_v1 = vpop.permute.xlu1 %398  ;;  %v414_v20 = vpop.permute.xlu0 %413 }
 0x30d   :  { %v433_v21 = vmul.f32 %v399_v1, %v659_v18  ;;  %v434_v56 = vmul.f32 %v399_v1, %v661_v19  ;;  %v439_v57 = vmul.f32 %v414_v20, %v687_v32  ;;  %v440_v12 = vmul.f32 %v414_v20, %v689_v33 }
 0x30f   :  { %457 = vst [vmem:[#allocation5 + $0x70] sm:$0xff] %v433_v21  ;;  %458 = vst [vmem:[#allocation5 + $0x78] sm:$0xff] %v434_v56 }
 0x310   :  { %463 = vst [vmem:[#allocation5 + $0xa0] sm:$0xff] %v439_v57  ;;  %464 = vst [vmem:[#allocation5 + $0xa8] sm:$0xff] %v440_v12  ;;  %v410_v13 = vpop.permute.xlu1 %409 }
 0x311   :  { %v437_v26 = vmul.f32 %v410_v13, %v671_v24  ;;  %v438_v27 = vmul.f32 %v410_v13, %v673_v25 }
 0x313   :  { %461 = vst [vmem:[#allocation5 + $0x90] sm:$0xff] %v437_v26  ;;  %462 = vst [vmem:[#allocation5 + $0x98] sm:$0xff] %v438_v27 }
 0x314   :  { %v418_v18 = vpop.permute.xlu1 %417 }
 0x315   :  { %v441_v19 = vmul.f32 %v418_v18, %v683_v30  ;;  %v442_v32 = vmul.f32 %v418_v18, %v685_v31 }
 0x317   :  { %465 = vst [vmem:[#allocation5 + $0xb0] sm:$0xff] %v441_v19  ;;  %466 = vst [vmem:[#allocation5 + $0xb8] sm:$0xff] %v442_v32 }
 0x318   :  { %556 = shalt.err (!%p553_p12)
}
 0x319   :  { %s557_s19 = scalar_lea.hbm %s774_s5, 3072 }
 0x31a   :  { %p558_p13 = scmp.ne.s32.totalorder %s774_s5, %s557_s19  ;;  %p561_p0 = scmp.lt.u32.totalorder %s557_s19, %s774_s5 }
 0x31c   :  { %p563_p1 = pnand %p561_p0, %p558_p13 }
 0x31e   :  { %566 = shalt.err (!%p563_p1)
}
 0x31f   :  { %478 = dma.vmem_to_hbm [thread:$0]  %s473_s3, 3072, %s774_s5, [#allocation4], %s572_s28, %s572_s28, %s573_s29  }
 0x320   :  { %569 = dma.done.wait [#allocation4], 3072  }
 0x321   :  { %570 = vsyncadd [#allocation4], 4294964224 }
 0x322   :  { %482 = vsyncpa [#allocation3], 1 }
 0x323   :  { %483 = vsyncpa [#allocation4], 1 }

</bundles_post_ra>
